<compile_context>
chip_gen: v5e
topology: v5e:2x2
jax: 0.10.0
libtpu: 0.0.40
codegen_flags: <defaults>
</compile_context>

<pallas_src>
import numpy as np
import jax
import jax.numpy as jnp
from jax import lax
from jax.experimental import pallas as pl
from jax.experimental.pallas import tpu as pltpu


def _round_up(x, m):
    return (x + m - 1) // m * m


def _cdiv(a, b):
    return (a + b - 1) // b


# -----------------------------------------------------------------------------
# Pallas kernel: one batch tile of the fused FCVPNN_time forward
# -----------------------------------------------------------------------------
def fcvpnn_kernel(x_ref, rhs1_ref, b1_ref, rhs2_ref, b2_ref, out_ref, x1_ref):
    T = x1_ref.shape[-1]

    x = x_ref[...].astype(rhs1_ref.dtype)               # in-kernel cast (bf16/f32)

    # fused VP reconstruction + fc1 pre-activation (one MXU pass, shared LHS)
    y = jnp.dot(x, rhs1_ref[...], preferred_element_type=jnp.float32) + b1_ref[...]

    # relu only on the fc1 columns; first T lanes (x1) pass through untouched
    col = lax.broadcasted_iota(jnp.int32, (1, y.shape[-1]), 1)
    z = jnp.where(col >= T, jnp.maximum(y, 0.0), y)

    # fc2 + residual folded into one matmul via the identity block in rhs2
    out = jnp.dot(z.astype(rhs2_ref.dtype), rhs2_ref[...],
                  preferred_element_type=jnp.float32) + b2_ref[...]

    x1_ref[...] = y[:, :T].astype(x1_ref.dtype)
    out_ref[...] = out.astype(out_ref.dtype)


# -----------------------------------------------------------------------------
# Factory: precompute folded weights once, return a jitted forward
# -----------------------------------------------------------------------------
def make_fcvpnn_time(t, params_init, w1, b1, w2, b2, *, use_bf16=False, block_b=4096):
    """w1: (T, H), b1: (H,), w2: (H, T), b2: (T,)  (Linear weights stored (in, out)).
    block_b should be a multiple of 8."""
    t64 = np.asarray(t, np.float64)
    p64 = np.asarray(params_init, np.float64)
    w1_64 = np.asarray(w1, np.float64)
    b1_64 = np.asarray(b1, np.float64)
    w2_64 = np.asarray(w2, np.float64)
    b2_64 = np.asarray(b2, np.float64)

    T = t64.shape[0]
    H = w1_64.shape[1]
    TH = T + H

    # ---- one-time precompute in f64 (hoisted off the hot path) --------------
    phi = np.exp(-p64[None, :] * t64[:, None])               # (T, K)
    P = np.linalg.pinv(phi).T @ phi.T                        # (T, T) VP projector
    w1_eff = P @ w1_64                                       # (T, H)  = P @ W1

    rhs1_np = np.concatenate([P, w1_eff], axis=1)            # (T, T+H)
    b1_np = np.concatenate([np.zeros(T), b1_64])[None, :]    # (1, T+H)
    rhs2_np = np.concatenate([np.eye(T), w2_64], axis=0)     # (T+H, T)
    b2_np = b2_64[None, :]                                   # (1, T)

    op_dtype = jnp.bfloat16 if use_bf16 else jnp.float32     # MXU operand dtype
    rhs1_j = jnp.asarray(rhs1_np, op_dtype)
    rhs2_j = jnp.asarray(rhs2_np, op_dtype)
    b1_j = jnp.asarray(b1_np, jnp.float32)                   # bias / accum stay f32
    b2_j = jnp.asarray(b2_np, jnp.float32)

    @jax.jit
    def forward(x):
        B = x.shape[0]
        assert x.shape[1] == T
        B_pad = _round_up(B, 8)
        xin = x if B_pad == B else jnp.pad(x, ((0, B_pad - B), (0, 0)))

        # Large batch tile to amortize ~0.35us per-step overhead, but keep
        # >= 4 grid steps when B allows so the "parallel" axis can shard
        # across v7x's 2 TensorCores.  Partial last tile handled by cdiv grid.
        tb = max(8, min(block_b, _round_up(_cdiv(B_pad, 4), 8)))
        grid = (_cdiv(B_pad, tb),)

        const = lambda i: (0, 0)                             # VMEM-resident weights
        out, x1 = pl.pallas_call(
            fcvpnn_kernel,
            out_shape=(
                jax.ShapeDtypeStruct((B_pad, T), jnp.float32),
                jax.ShapeDtypeStruct((B_pad, T), jnp.float32),
            ),
            grid=grid,
            in_specs=[
                pl.BlockSpec((tb, T), lambda i: (i, 0)),     # streamed x tile
                pl.BlockSpec((T, TH), const),                # [P | W1_eff]
                pl.BlockSpec((1, TH), const),                # [0 | b1]
                pl.BlockSpec((TH, T), const),                # [I ; W2]
                pl.BlockSpec((1, T), const),                 # b2
            ],
            out_specs=(
                pl.BlockSpec((tb, T), lambda i: (i, 0)),     # out (unpadded T)
                pl.BlockSpec((tb, T), lambda i: (i, 0)),     # x1  (unpadded T)
            ),
            compiler_params=pltpu.CompilerParams(
                dimension_semantics=("parallel",),           # batch axis parallel
            ),
        )(xin, rhs1_j, b1_j, rhs2_j, b2_j)

        return out[:B], x1[:B]

    return forward


# -----------------------------------------------------------------------------
# float64 numpy gold reference (unfolded math, mirrors the PyTorch module)
# -----------------------------------------------------------------------------
def reference_forward_f64(x, t, params, w1, b1, w2, b2):
    x = np.asarray(x, np.float64)
    t = np.asarray(t, np.float64)
    params = np.asarray(params, np.float64)
    w1 = np.asarray(w1, np.float64)
    b1 = np.asarray(b1, np.float64)
    w2 = np.asarray(w2, np.float64)
    b2 = np.asarray(b2, np.float64)
    phi = np.exp(-params[None, :] * t[:, None])
    coeffs = x @ np.linalg.pinv(phi).T
    x1 = coeffs @ phi.T
    h = np.maximum(x1 @ w1 + b1, 0.0)
    x_fc = h @ w2 + b2
    return x1 + x_fc, x1


if __name__ == "__main__":
    B, T, K, H = 8, 16, 4, 64

    key = jax.random.PRNGKey(0)
    k_x, k_w1, k_b1, k_w2, k_b2 = jax.random.split(key, 5)

    # time grid and VP nonlinear params (deterministic)
    t = jnp.linspace(0.0, 1.0, T, dtype=jnp.float32)
    params_init = jnp.array([0.5, 1.0, 2.0, 4.0], dtype=jnp.float32)

    # FC parameters (nn.Linear(len(t), 64), nn.Linear(64, len(t))), stored (in, out)
    w1 = jax.random.uniform(k_w1, (T, H), jnp.float32, -0.25, 0.25)
    b1 = jax.random.uniform(k_b1, (H,), jnp.float32, -0.25, 0.25)
    w2 = jax.random.uniform(k_w2, (H, T), jnp.float32, -0.125, 0.125)
    b2 = jax.random.uniform(k_b2, (T,), jnp.float32, -0.125, 0.125)

    # example input signal (B, T)
    x = jax.random.normal(k_x, (B, T), jnp.float32)

    # use_bf16=False here so the numerical check against the f64 gold reference
    # stays tight; flip to True on v5e/v6e/v7x for production throughput.
    forward = make_fcvpnn_time(t, params_init, w1, b1, w2, b2, use_bf16=False)

    out, x1 = forward(x)
    out = jax.block_until_ready(out)
    x1 = jax.block_until_ready(x1)

    gold_out, gold_x1 = reference_forward_f64(x, t, params_init, w1, b1, w2, b2)
    assert np.allclose(np.asarray(out), gold_out, atol=1e-3, rtol=1e-3)
    assert np.allclose(np.asarray(x1), gold_x1, atol=1e-3, rtol=1e-3)

    print("KERNEL_OK")
</pallas_src>

<mosaic_0001>
module attributes {stable_mosaic.version = 11 : i64} {
  func.func @fcvpnn_kernel(%arg0: i32, %arg1: memref<8x16xf32, #tpu.memory_space<vmem>>, %arg2: memref<16x80xf32, #tpu.memory_space<vmem>>, %arg3: memref<1x80xf32, #tpu.memory_space<vmem>>, %arg4: memref<80x16xf32, #tpu.memory_space<vmem>>, %arg5: memref<1x16xf32, #tpu.memory_space<vmem>>, %arg6: memref<8x16xf32, #tpu.memory_space<vmem>>, %arg7: memref<8x16xf32, #tpu.memory_space<vmem>>) attributes {dimension_semantics = [#tpu.dimension_semantics<parallel>], iteration_bounds = array<i64: 1>, scalar_prefetch = 0 : i64, scratch_operands = 0 : i64, tpu.core_type = #tpu.core_type<tc>, window_params = [{transform_indices = @transform_0, window_bounds = array<i64: 8, 16>}, {pipeline_mode = #tpu.pipeline_mode<synchronous>, transform_indices = @transform_1, window_bounds = array<i64: 16, 80>}, {pipeline_mode = #tpu.pipeline_mode<synchronous>, transform_indices = @transform_2, window_bounds = array<i64: 1, 80>}, {pipeline_mode = #tpu.pipeline_mode<synchronous>, transform_indices = @transform_3, window_bounds = array<i64: 80, 16>}, {pipeline_mode = #tpu.pipeline_mode<synchronous>, transform_indices = @transform_4, window_bounds = array<i64: 1, 16>}, {transform_indices = @transform_5, window_bounds = array<i64: 8, 16>}, {transform_indices = @transform_6, window_bounds = array<i64: 8, 16>}]} {
    %c0 = arith.constant 0 : index
    %c0_0 = arith.constant 0 : index
    %0 = vector.load %arg1[%c0, %c0_0] : memref<8x16xf32, #tpu.memory_space<vmem>>, vector<8x16xf32>
    %c0_1 = arith.constant 0 : index
    %c0_2 = arith.constant 0 : index
    %1 = vector.load %arg2[%c0_1, %c0_2] : memref<16x80xf32, #tpu.memory_space<vmem>>, vector<16x80xf32>
    %cst = arith.constant dense<0.000000e+00> : vector<8x80xf32>
    %2 = tpu.matmul %0, %1, %cst {dimension_numbers = #tpu.dot_dimension_numbers<[1], [0], [0], [1], [0, 0, 1, 1], [], []>} : vector<8x16xf32>, vector<16x80xf32>, vector<8x80xf32> -> vector<8x80xf32>
    %c0_3 = arith.constant 0 : index
    %c0_4 = arith.constant 0 : index
    %3 = vector.load %arg3[%c0_3, %c0_4] : memref<1x80xf32, #tpu.memory_space<vmem>>, vector<1x80xf32>
    %4 = vector.broadcast %3 : vector<1x80xf32> to vector<8x80xf32>
    %5 = arith.addf %2, %4 : vector<8x80xf32>
    %6 = tpu.iota {dimensions = array<i32: 1>} : vector<1x80xi32>
    %c16_i32 = arith.constant 16 : i32
    %7 = vector.broadcast %c16_i32 : i32 to vector<1x80xi32>
    %8 = arith.cmpi sge, %6, %7 : vector<1x80xi32>
    %cst_5 = arith.constant 0.000000e+00 : f32
    %9 = vector.broadcast %cst_5 : f32 to vector<8x80xf32>
    %10 = arith.maximumf %5, %9 : vector<8x80xf32>
    %11 = vector.shape_cast %8 : vector<1x80xi1> to vector<1x80xi1>
    %12 = vector.broadcast %11 : vector<1x80xi1> to vector<8x80xi1>
    %13 = arith.select %12, %10, %5 : vector<8x80xi1>, vector<8x80xf32>
    %c0_6 = arith.constant 0 : index
    %c0_7 = arith.constant 0 : index
    %14 = vector.load %arg4[%c0_6, %c0_7] : memref<80x16xf32, #tpu.memory_space<vmem>>, vector<80x16xf32>
    %cst_8 = arith.constant dense<0.000000e+00> : vector<8x16xf32>
    %15 = tpu.matmul %13, %14, %cst_8 {dimension_numbers = #tpu.dot_dimension_numbers<[1], [0], [0], [1], [0, 0, 1, 1], [], []>} : vector<8x80xf32>, vector<80x16xf32>, vector<8x16xf32> -> vector<8x16xf32>
    %c0_9 = arith.constant 0 : index
    %c0_10 = arith.constant 0 : index
    %16 = vector.load %arg5[%c0_9, %c0_10] : memref<1x16xf32, #tpu.memory_space<vmem>>, vector<1x16xf32>
    %17 = vector.broadcast %16 : vector<1x16xf32> to vector<8x16xf32>
    %18 = arith.addf %15, %17 : vector<8x16xf32>
    %19 = vector.extract_strided_slice %5 {offsets = [0, 0], sizes = [8, 16], strides = [1, 1]} : vector<8x80xf32> to vector<8x16xf32>
    %c0_11 = arith.constant 0 : index
    %c0_12 = arith.constant 0 : index
    %20 = vector.load %arg7[%c0_11, %c0_12] : memref<8x16xf32, #tpu.memory_space<vmem>>, vector<8x16xf32>
    tpu.vector_store %arg7[%c0_11, %c0_12], %19 {strides = array<i32>} : memref<8x16xf32, #tpu.memory_space<vmem>>, vector<8x16xf32>,
    %c0_13 = arith.constant 0 : index
    %c0_14 = arith.constant 0 : index
    %21 = vector.load %arg6[%c0_13, %c0_14] : memref<8x16xf32, #tpu.memory_space<vmem>>, vector<8x16xf32>
    tpu.vector_store %arg6[%c0_13, %c0_14], %18 {strides = array<i32>} : memref<8x16xf32, #tpu.memory_space<vmem>>, vector<8x16xf32>,
    return
  }
  func.func @transform_0(%arg0: i32) -> (i32, i32) {
    %c0_i32 = arith.constant 0 : i32
    %c0_i32_0 = arith.constant 0 : i32
    return %arg0, %c0_i32 : i32, i32
  }
  func.func @transform_1(%arg0: i32) -> (i32, i32) {
    %c0_i32 = arith.constant 0 : i32
    %c0_i32_0 = arith.constant 0 : i32
    %c0_i32_1 = arith.constant 0 : i32
    return %c0_i32, %c0_i32_0 : i32, i32
  }
  func.func @transform_2(%arg0: i32) -> (i32, i32) {
    %c0_i32 = arith.constant 0 : i32
    %c0_i32_0 = arith.constant 0 : i32
    %c0_i32_1 = arith.constant 0 : i32
    return %c0_i32, %c0_i32_0 : i32, i32
  }
  func.func @transform_3(%arg0: i32) -> (i32, i32) {
    %c0_i32 = arith.constant 0 : i32
    %c0_i32_0 = arith.constant 0 : i32
    %c0_i32_1 = arith.constant 0 : i32
    return %c0_i32, %c0_i32_0 : i32, i32
  }
  func.func @transform_4(%arg0: i32) -> (i32, i32) {
    %c0_i32 = arith.constant 0 : i32
    %c0_i32_0 = arith.constant 0 : i32
    %c0_i32_1 = arith.constant 0 : i32
    return %c0_i32, %c0_i32_0 : i32, i32
  }
  func.func @transform_5(%arg0: i32) -> (i32, i32) {
    %c0_i32 = arith.constant 0 : i32
    %c0_i32_0 = arith.constant 0 : i32
    return %arg0, %c0_i32 : i32, i32
  }
  func.func @transform_6(%arg0: i32) -> (i32, i32) {
    %c0_i32 = arith.constant 0 : i32
    %c0_i32_0 = arith.constant 0 : i32
    return %arg0, %c0_i32 : i32, i32
  }
}

</mosaic_0001>

<bundles_post_ra>
// kernel: forward.1
= control target key start
LH: loop header
LB: loop body
LE: loop exit
PB: predicated region body
PF: predicated region fallthrough
CT: control target
= control target key end

     0   :  { %12 = vsyncpa [#allocation3], 0  ;;  %s429_s0 = inlined_call_operand.hbm [shape: f32[8,16], index: 0, kind: input, shape index: {}]   ;;  %s430_s1 = inlined_call_operand.hbm [shape: f32[16,80], index: 1, kind: input, shape index: {}]   ;;  %s431_s2 = inlined_call_operand.hbm [shape: f32[1,80], index: 2, kind: input, shape index: {}]   ;;  %s432_s3 = inlined_call_operand.hbm [shape: f32[80,16], index: 3, kind: input, shape index: {}]   ;;  %s433_s4 = inlined_call_operand.vmem [shape: f32[1,16], index: 4, kind: input, shape index: {}]   ;;  %s434_s5 = inlined_call_operand.hbm [shape: f32[8,16], index: 5, kind: output, shape index: {0}]   ;;  %s435_s6 = inlined_call_operand.hbm [shape: f32[8,16], index: 6, kind: output, shape index: {1}]  }
   0x1   :  { %13 = vsyncpa [#allocation6], 0 }
   0x2   :  { %14 = vsyncpa [#allocation9], 0 }
   0x3   :  { %15 = vsyncpa [#allocation4], 0  ;;  %s32_s23 = sshll.u32 %s430_s1, 4  ;;  %s33_s23 = int_to_ptr.hbm [resolvable:$true] %s32_s23 }
   0x4   :  { %16 = vsyncpa [#allocation12], 0  ;;  %s362_s24 = smov [#allocation5]   ;;  %s22_s28 = sshll.u32 %s429_s0, 4  ;;  %s23_s28 = int_to_ptr.hbm [resolvable:$true] %s22_s28 }
   0x5   :  { %s34_s25 = sshll.u32 %s362_s24, 4  ;;  %s363_s29 = smov 128   ;;  %s35_s25 = int_to_ptr.vmem [resolvable:$true] %s34_s25 }
   0x6   :  { %s364_s30 = smov 8   ;;  %s365_s7 = smov [#allocation2]  }
   0x7   :  { %40 = dma.hbm_to_vmem [thread:$0]  %s33_s23, 256, %s35_s25, [#allocation6], %s363_s29, %s363_s29, %s364_s30  }
   0x8   :  { %s24_s8 = sshll.u32 %s365_s7, 4  ;;  %s46_s11 = sshll.u32 %s431_s2, 4  ;;  %s25_s8 = int_to_ptr.vmem [resolvable:$true] %s24_s8  ;;  %s47_s11 = int_to_ptr.hbm [resolvable:$true] %s46_s11 }
   0x9   :  { %27 = dma.hbm_to_vmem [thread:$0]  %s23_s28, 128, %s25_s8, [#allocation3]  }
   0xa   :  { %s56_s13 = sshll.u32 %s432_s3, 4  ;;  %s366_s14 = smov [#allocation7]   ;;  %s57_s13 = int_to_ptr.hbm [resolvable:$true] %s56_s13 }
   0xb   :  { %s48_s15 = sshll.u32 %s366_s14, 4  ;;  %s367_s0 = smov [#allocation8]   ;;  %s49_s15 = int_to_ptr.vmem [resolvable:$true] %s48_s15 }
   0xc   :  { %51 = dma.hbm_to_vmem [thread:$0]  %s47_s11, 16, %s49_s15, [#allocation6]  }
   0xd   :  { %s58_s16 = sshll.u32 %s367_s0, 4  ;;  %s59_s16 = int_to_ptr.vmem [resolvable:$true] %s58_s16 }
   0xe   :  { %64 = dma.hbm_to_vmem [thread:$0]  %s57_s13, 1280, %s59_s16, [#allocation9], %s363_s29, %s363_s29, %s364_s30  }
   0xf   :  { %352 = dma.done.wait [#allocation3], 128  }
  0x10   :  { %353 = vsyncadd [#allocation3], 4294967168 }
  0x11   :  { %354 = dma.done.wait [#allocation6], 272  }
  0x12   :  { %355 = vsyncadd [#allocation6], 4294967024 }
  0x13   :  { %356 = dma.done.wait [#allocation9], 1280  }
  0x14   :  { %357 = vsyncadd [#allocation9], 4294966016  ;;  %v85_v0 = vld [vmem:[#allocation5 + $0x8] sm:$0xff]  ;;  %v84_v1 = vld [vmem:[#allocation5] sm:$0xff]  ;;  %vm90_vm0 = vcmask 130048   ;;  %v114_v13 = vlaneseq  ;;  %vm135_vm2 = vcmask 654336  }
  0x15   :  { %108 = vmatpush.msra.mxu0 %v85_v0  ;;  %v83_v2 = vld [vmem:[#allocation2] sm:$0xff]  ;;  %v128_v5 = vld [vmem:[#allocation8 + $0x38] sm:$0xff]  ;;  %v127_v6 = vld [vmem:[#allocation8 + $0x30] sm:$0xff]  ;;  %s368_s2 = smov [#allocation11]   ;;  %s179_s19 = sshll.u32 %s435_s6, 4  ;;  %s180_s19 = int_to_ptr.hbm [resolvable:$true] %s179_s19 }
  0x16   :  { %v130_v3 = vld [vmem:[#allocation8 + $0x48] sm:$0xff]  ;;  %v129_v4 = vld [vmem:[#allocation8 + $0x40] sm:$0xff]  ;;  %v124_v9 = vld [vmem:[#allocation8 + $0x18] sm:$0xff]  ;;  %v115_v15 = vand.u32 127, %v114_v13  ;;  %s177_s3 = sshll.u32 %s368_s2, 4  ;;  %s369_s22 = smov [#allocation10]   ;;  %s178_s3 = int_to_ptr.vmem [resolvable:$true] %s177_s3 }
  0x17   :  { %145 = vmatpush.msra.mxu1 %v130_v3  ;;  %109 = vmatpush.msra.mxu0 %v84_v1  ;;  %v126_v7 = vld [vmem:[#allocation8 + $0x28] sm:$0xff]  ;;  %v125_v8 = vld [vmem:[#allocation8 + $0x20] sm:$0xff]  ;;  %v123_v10 = vld [vmem:[#allocation8 + $0x10] sm:$0xff]  ;;  %s166_s23 = sshll.u32 %s369_s22, 4  ;;  %s168_s26 = sshll.u32 %s434_s5, 4  ;;  %s167_s23 = int_to_ptr.vmem [resolvable:$true] %s166_s23  ;;  %s169_s26 = int_to_ptr.hbm [resolvable:$true] %s168_s26 }
  0x18   :  { %196 = vmatmul.msk.f32.vlgmr.msra.gmra.mxu0 %vm90_vm0, %v83_v2  ;;  %v122_v11 = vld [vmem:[#allocation8 + $0x8] sm:$0xff]  ;;  %v121_v12 = vld [vmem:[#allocation8] sm:$0xff]  ;;  %v206_v14 = vld [vmem:[#allocation7] ss:$0 sm:$0xff]  ;;  %vm116_vm1 = vcmp.ge.s32.totalorder %v115_v15, 16 }
  0x19   :  { %146 = vmatpush.msra.mxu1 %v129_v4  ;;  %v207_v20 = vld [vmem:[%s433_s4] ss:$0 sm:$0xff] }
  0x1b   :  { %147 = vmatpush.msra.mxu1 %v128_v5 }
  0x1d   :  { %148 = vmatpush.msra.mxu1 %v127_v6 }
  0x1f   :  { %149 = vmatpush.msra.mxu1 %v126_v7 }
  0x21   :  { %150 = vmatpush.msra.mxu1 %v125_v8 }
  0x23   :  { %151 = vmatpush.msra.mxu1 %v124_v9 }
  0x25   :  { %152 = vmatpush.msra.mxu1 %v123_v10 }
  0x27   :  { %153 = vmatpush.msra.mxu1 %v122_v11 }
  0x29   :  { %154 = vmatpush.msra.mxu1 %v121_v12 }
  0x95   :  { %v111_v16 = vpop.f32.mrf.mxu0 }
  0x96   :  { %v112_v17 = vadd.f32 %v206_v14, %v111_v16 }
  0x98   :  { %v117_v18 = vmax.f32 %v112_v17, 0.0  ;;  %159 = vst.msk [vmem:[#allocation11] sm:$0xff] %vm90_vm0, %v112_v17 }
  0x99   :  { %182 = dma.vmem_to_hbm [thread:$0]  %s178_s3, 128, %s180_s19, [#allocation12]  }
  0x9a   :  { %v120_v19 = vsel %vm116_vm1, %v117_v18, %v112_v17 }
  0x9b   :  { %197 = vmatmul.msk.f32.vlgmr.msra.gmra.mxu1 %vm135_vm2, %v120_v19 }
 0x118   :  { %v156_v21 = vpop.f32.mrf.mxu1 }
 0x119   :  { %v157_v22 = vadd.f32 %v207_v20, %v156_v21 }
 0x11b   :  { %160 = vst.msk [vmem:[#allocation10] sm:$0xff] %vm90_vm0, %v157_v22 }
 0x11c   :  { %171 = dma.vmem_to_hbm [thread:$0]  %s167_s23, 128, %s169_s26, [#allocation4]  }
 0x11d   :  { %358 = dma.done.wait [#allocation4], 128  }
 0x11e   :  { %359 = vsyncadd [#allocation4], 4294967168 }
 0x11f   :  { %360 = dma.done.wait [#allocation12], 128  }
 0x120   :  { %361 = vsyncadd [#allocation12], 4294967168 }
 0x121   :  { %191 = vsyncpa [#allocation3], 1 }
 0x122   :  { %192 = vsyncpa [#allocation6], 1 }
 0x123   :  { %193 = vsyncpa [#allocation9], 1 }
 0x124   :  { %194 = vsyncpa [#allocation4], 1 }
 0x125   :  { %195 = vsyncpa [#allocation12], 1 }

</bundles_post_ra>
